<compile_context>
chip_gen: v6e
topology: v6e:2x2x1
jax: 0.10.0
libtpu: 0.0.40
codegen_flags: <defaults>
</compile_context>

<pallas_src>
import functools
import numpy as np
import jax
import jax.numpy as jnp
from jax.experimental import pallas as pl
from jax.experimental.pallas import tpu as pltpu

WINDOW_SIZE = 11
SIGMA = 1.5
C1 = 0.01 ** 2
C2 = 0.03 ** 2


def _gaussian_1d(window_size=WINDOW_SIZE, sigma=SIGMA):
    # Deterministic "parameter" init — mirrors gaussian()/create_window().
    x = np.arange(window_size, dtype=np.float64)
    g = np.exp(-((x - window_size // 2) ** 2) / (2.0 * sigma ** 2))
    g = g / g.sum()
    return g.astype(np.float32)


def _band_matrix(n, g):
    """Band matrix M with M[i, j] = g[j - i + p] for |j - i| <= p, else 0.

    x_blurred = M @ x   (vertical pass)   /   x @ M.T  (horizontal pass)
    reproduces a zero-padded cross-correlation with the 1D gaussian
    (identical to F.conv2d with padding = window_size // 2).
    """
    ws = g.shape[0]
    p = ws // 2
    m = np.zeros((n, n), np.float32)
    for d in range(-p, p + 1):
        i = np.arange(max(0, -d), min(n, n - d))
        if i.size:
            m[i, i + d] = g[d + p]
    return m


def _ssim_kernel(a_ref, b_ref, img1_ref, img2_ref, out_ref, *, rows):
    # One grid step = one group of channels of one image, laid out as a
    # (rows, W) slab with rows = G * H.
    x1 = img1_ref[0].astype(jnp.float32) * 0.5 + 0.5          # (rows, W)
    x2 = img2_ref[0].astype(jnp.float32) * 0.5 + 0.5
    a = a_ref[...]                                            # (rows, rows) vertical band (block-diag)
    b = b_ref[...]                                            # (W, W)      horizontal band

    # Stack the five moment maps along rows -> one MXU pass for the horizontal blur.
    s = jnp.concatenate([x1, x2, x1 * x1, x2 * x2, x1 * x2], axis=0)   # (5*rows, W)
    t = jnp.dot(s, b, preferred_element_type=jnp.float32)             # horizontal blur

    def vblur(m):                                                      # vertical blur (MXU)
        return jnp.dot(a, t[m * rows:(m + 1) * rows, :],
                       preferred_element_type=jnp.float32)

    mu1, mu2, e11, e22, e12 = [vblur(m) for m in range(5)]

    mu1_sq = mu1 * mu1
    mu2_sq = mu2 * mu2
    mu1_mu2 = mu1 * mu2
    sigma1_sq = e11 - mu1_sq
    sigma2_sq = e22 - mu2_sq
    sigma12 = e12 - mu1_mu2

    num = (2.0 * mu1_mu2 + C1) * (2.0 * sigma12 + C2)
    den = (mu1_sq + mu2_sq + C1) * (sigma1_sq + sigma2_sq + C2)
    ssim_map = num * pl.reciprocal(den, approx=False)                  # EUP, not VALU divide

    out_ref[...] = jnp.sum(ssim_map).reshape(1, 1, 1)


def ssim_pallas(img1, img2, window_size=WINDOW_SIZE, size_average=True):
    assert img1.shape == img2.shape
    N, C, H, W = img1.shape
    g = _gaussian_1d(window_size)

    # Channel-group size: fold all channels of an image into one grid step when
    # the plane is lane-sparse (W < 128) and the block-diagonal vertical band
    # stays small; otherwise one (H, W) plane per step.
    G = C if (W < 128 and C * H <= 2048) else 1
    rows = G * H
    P = (N * C) // G                                  # number of grid steps

    band_h = _band_matrix(H, g)                       # vertical band (H, H)
    band_w = _band_matrix(W, g).T                     # horizontal band (W, W); symmetric gaussian
    a_bd = np.zeros((rows, rows), np.float32)         # block-diagonal over G channels
    for c in range(G):
        a_bd[c * H:(c + 1) * H, c * H:(c + 1) * H] = band_h

    # Pure view reshapes; inputs stay in their native dtype (kernel upcasts).
    x1 = img1.reshape(P, rows, W)
    x2 = img2.reshape(P, rows, W)

    kernel = functools.partial(_ssim_kernel, rows=rows)

    itemsize = jnp.dtype(img1.dtype).itemsize
    flops = int(P * (2 * 5 * rows * W * W          # horizontal band matmul
                     + 5 * 2 * rows * rows * W     # vertical band matmuls
                     + 30 * rows * W))             # SSIM-map elementwise
    bytes_accessed = int(2 * N * C * H * W * itemsize
                         + a_bd.nbytes + band_w.nbytes + P * 4)

    group_sums = pl.pallas_call(
        kernel,
        out_shape=jax.ShapeDtypeStruct((P, 1, 1), jnp.float32),
        grid_spec=pltpu.PrefetchScalarGridSpec(
            num_scalar_prefetch=0,
            grid=(P,),
            in_specs=[
                pl.BlockSpec((rows, rows), lambda i: (0, 0)),      # vertical band (constant)
                pl.BlockSpec((W, W), lambda i: (0, 0)),            # horizontal band (constant)
                pl.BlockSpec((1, rows, W), lambda i: (i, 0, 0)),   # img1 slab
                pl.BlockSpec((1, rows, W), lambda i: (i, 0, 0)),   # img2 slab
            ],
            out_specs=pl.BlockSpec((1, 1, 1), lambda i: (i, 0, 0)),
        ),
        compiler_params=pltpu.CompilerParams(
            dimension_semantics=("parallel",),
            vmem_limit_bytes=64 * 1024 * 1024),
        cost_estimate=pl.CostEstimate(
            flops=flops,
            transcendentals=int(P * rows * W),
            bytes_accessed=bytes_accessed),
    )(jnp.asarray(a_bd), jnp.asarray(band_w), x1, x2)

    group_sums = group_sums.reshape(N, C // G)
    if size_average:
        return jnp.sum(group_sums) / (N * C * H * W)
    else:
        # ssim_map.mean(1).mean(1).mean(1) == per-image mean over (C, H, W)
        return jnp.sum(group_sums, axis=1) / (C * H * W)


def ssim_reference(img1, img2, window_size=WINDOW_SIZE):
    # Pure-JAX reference (XLA depthwise conv), mirrors the PyTorch _ssim exactly.
    N, C, H, W = img1.shape
    g = _gaussian_1d(window_size)
    w2d = np.outer(g, g).astype(np.float32)
    window = jnp.asarray(np.ascontiguousarray(
        np.broadcast_to(w2d, (C, 1, window_size, window_size))))
    x1 = img1.astype(jnp.float32) * 0.5 + 0.5
    x2 = img2.astype(jnp.float32) * 0.5 + 0.5

    def conv(x):
        return jax.lax.conv_general_dilated(
            x, window, window_strides=(1, 1),
            padding=[(window_size // 2, window_size // 2)] * 2,
            feature_group_count=C,
            dimension_numbers=("NCHW", "OIHW", "NCHW"))

    mu1 = conv(x1)
    mu2 = conv(x2)
    mu1_sq = mu1 * mu1
    mu2_sq = mu2 * mu2
    mu1_mu2 = mu1 * mu2
    sigma1_sq = conv(x1 * x1) - mu1_sq
    sigma2_sq = conv(x2 * x2) - mu2_sq
    sigma12 = conv(x1 * x2) - mu1_mu2
    ssim_map = ((2 * mu1_mu2 + C1) * (2 * sigma12 + C2)) / (
        (mu1_sq + mu2_sq + C1) * (sigma1_sq + sigma2_sq + C2))
    return jnp.mean(ssim_map)


if __name__ == "__main__":
    key = jax.random.PRNGKey(0)
    k1, k2 = jax.random.split(key)
    N, C, H, W = 2, 4, 16, 16
    img1 = jax.random.normal(k1, (N, C, H, W), dtype=jnp.float32)
    img2 = img1 + 0.1 * jax.random.normal(k2, (N, C, H, W), dtype=jnp.float32)

    out = ssim_pallas(img1, img2)
    out = jax.block_until_ready(out)

    ref = jax.block_until_ready(ssim_reference(img1, img2))
    assert np.allclose(np.asarray(out), np.asarray(ref), atol=1e-4, rtol=1e-4), (
        float(out), float(ref))

    print("KERNEL_OK")
</pallas_src>

<mosaic_0001>
module attributes {stable_mosaic.version = 11 : i64} {
  func.func @_ssim_kernel(%arg0: i32, %arg1: memref<64x64xf32, #tpu.memory_space<vmem>>, %arg2: memref<16x16xf32, #tpu.memory_space<vmem>>, %arg3: memref<1x64x16xf32, #tpu.memory_space<vmem>>, %arg4: memref<1x64x16xf32, #tpu.memory_space<vmem>>, %arg5: memref<1x1x1xf32, #tpu.memory_space<vmem>>) attributes {dimension_semantics = [#tpu.dimension_semantics<parallel>], iteration_bounds = array<i64: 2>, scalar_prefetch = 0 : i64, scratch_operands = 0 : i64, tpu.core_type = #tpu.core_type<tc>, window_params = [{pipeline_mode = #tpu.pipeline_mode<synchronous>, transform_indices = @transform_0, window_bounds = array<i64: 64, 64>}, {pipeline_mode = #tpu.pipeline_mode<synchronous>, transform_indices = @transform_1, window_bounds = array<i64: 16, 16>}, {transform_indices = @transform_2, window_bounds = array<i64: 1, 64, 16>}, {transform_indices = @transform_3, window_bounds = array<i64: 1, 64, 16>}, {transform_indices = @transform_4, window_bounds = array<i64: 1, 1, 1>}]} {
    %c0 = arith.constant 0 : index
    %c0_0 = arith.constant 0 : index
    %c0_1 = arith.constant 0 : index
    %0 = vector.load %arg3[%c0, %c0_0, %c0_1] : memref<1x64x16xf32, #tpu.memory_space<vmem>>, vector<1x64x16xf32>
    %1 = vector.shape_cast %0 : vector<1x64x16xf32> to vector<64x16xf32>
    %cst = arith.constant 5.000000e-01 : f32
    %2 = vector.broadcast %cst : f32 to vector<64x16xf32>
    %3 = arith.mulf %1, %2 : vector<64x16xf32>
    %cst_2 = arith.constant 5.000000e-01 : f32
    %4 = vector.broadcast %cst_2 : f32 to vector<64x16xf32>
    %5 = arith.addf %3, %4 : vector<64x16xf32>
    %c0_3 = arith.constant 0 : index
    %c0_4 = arith.constant 0 : index
    %c0_5 = arith.constant 0 : index
    %6 = vector.load %arg4[%c0_3, %c0_4, %c0_5] : memref<1x64x16xf32, #tpu.memory_space<vmem>>, vector<1x64x16xf32>
    %7 = vector.shape_cast %6 : vector<1x64x16xf32> to vector<64x16xf32>
    %cst_6 = arith.constant 5.000000e-01 : f32
    %8 = vector.broadcast %cst_6 : f32 to vector<64x16xf32>
    %9 = arith.mulf %7, %8 : vector<64x16xf32>
    %cst_7 = arith.constant 5.000000e-01 : f32
    %10 = vector.broadcast %cst_7 : f32 to vector<64x16xf32>
    %11 = arith.addf %9, %10 : vector<64x16xf32>
    %c0_8 = arith.constant 0 : index
    %c0_9 = arith.constant 0 : index
    %12 = vector.load %arg1[%c0_8, %c0_9] : memref<64x64xf32, #tpu.memory_space<vmem>>, vector<64x64xf32>
    %c0_10 = arith.constant 0 : index
    %c0_11 = arith.constant 0 : index
    %13 = vector.load %arg2[%c0_10, %c0_11] : memref<16x16xf32, #tpu.memory_space<vmem>>, vector<16x16xf32>
    %14 = arith.mulf %5, %5 : vector<64x16xf32>
    %15 = arith.mulf %11, %11 : vector<64x16xf32>
    %16 = arith.mulf %5, %11 : vector<64x16xf32>
    %17 = tpu.concatenate %5, %11, %14, %15, %16 in 0 : vector<64x16xf32>, vector<64x16xf32>, vector<64x16xf32>, vector<64x16xf32>, vector<64x16xf32> -> vector<320x16xf32>
    %cst_12 = arith.constant dense<0.000000e+00> : vector<320x16xf32>
    %18 = tpu.matmul %17, %13, %cst_12 {dimension_numbers = #tpu.dot_dimension_numbers<[1], [0], [0], [1], [0, 0, 1, 1], [], []>} : vector<320x16xf32>, vector<16x16xf32>, vector<320x16xf32> -> vector<320x16xf32>
    %19 = vector.extract_strided_slice %18 {offsets = [0, 0], sizes = [64, 16], strides = [1, 1]} : vector<320x16xf32> to vector<64x16xf32>
    %cst_13 = arith.constant dense<0.000000e+00> : vector<64x16xf32>
    %20 = tpu.matmul %12, %19, %cst_13 {dimension_numbers = #tpu.dot_dimension_numbers<[1], [0], [0], [1], [0, 0, 1, 1], [], []>} : vector<64x64xf32>, vector<64x16xf32>, vector<64x16xf32> -> vector<64x16xf32>
    %21 = vector.extract_strided_slice %18 {offsets = [64, 0], sizes = [64, 16], strides = [1, 1]} : vector<320x16xf32> to vector<64x16xf32>
    %cst_14 = arith.constant dense<0.000000e+00> : vector<64x16xf32>
    %22 = tpu.matmul %12, %21, %cst_14 {dimension_numbers = #tpu.dot_dimension_numbers<[1], [0], [0], [1], [0, 0, 1, 1], [], []>} : vector<64x64xf32>, vector<64x16xf32>, vector<64x16xf32> -> vector<64x16xf32>
    %23 = vector.extract_strided_slice %18 {offsets = [128, 0], sizes = [64, 16], strides = [1, 1]} : vector<320x16xf32> to vector<64x16xf32>
    %cst_15 = arith.constant dense<0.000000e+00> : vector<64x16xf32>
    %24 = tpu.matmul %12, %23, %cst_15 {dimension_numbers = #tpu.dot_dimension_numbers<[1], [0], [0], [1], [0, 0, 1, 1], [], []>} : vector<64x64xf32>, vector<64x16xf32>, vector<64x16xf32> -> vector<64x16xf32>
    %25 = vector.extract_strided_slice %18 {offsets = [192, 0], sizes = [64, 16], strides = [1, 1]} : vector<320x16xf32> to vector<64x16xf32>
    %cst_16 = arith.constant dense<0.000000e+00> : vector<64x16xf32>
    %26 = tpu.matmul %12, %25, %cst_16 {dimension_numbers = #tpu.dot_dimension_numbers<[1], [0], [0], [1], [0, 0, 1, 1], [], []>} : vector<64x64xf32>, vector<64x16xf32>, vector<64x16xf32> -> vector<64x16xf32>
    %27 = vector.extract_strided_slice %18 {offsets = [256, 0], sizes = [64, 16], strides = [1, 1]} : vector<320x16xf32> to vector<64x16xf32>
    %cst_17 = arith.constant dense<0.000000e+00> : vector<64x16xf32>
    %28 = tpu.matmul %12, %27, %cst_17 {dimension_numbers = #tpu.dot_dimension_numbers<[1], [0], [0], [1], [0, 0, 1, 1], [], []>} : vector<64x64xf32>, vector<64x16xf32>, vector<64x16xf32> -> vector<64x16xf32>
    %29 = arith.mulf %20, %20 : vector<64x16xf32>
    %30 = arith.mulf %22, %22 : vector<64x16xf32>
    %31 = arith.mulf %20, %22 : vector<64x16xf32>
    %32 = arith.subf %24, %29 : vector<64x16xf32>
    %33 = arith.subf %26, %30 : vector<64x16xf32>
    %34 = arith.subf %28, %31 : vector<64x16xf32>
    %cst_18 = arith.constant 2.000000e+00 : f32
    %35 = vector.broadcast %cst_18 : f32 to vector<64x16xf32>
    %36 = arith.mulf %35, %31 : vector<64x16xf32>
    %cst_19 = arith.constant 9.99999974E-5 : f32
    %37 = vector.broadcast %cst_19 : f32 to vector<64x16xf32>
    %38 = arith.addf %36, %37 : vector<64x16xf32>
    %cst_20 = arith.constant 2.000000e+00 : f32
    %39 = vector.broadcast %cst_20 : f32 to vector<64x16xf32>
    %40 = arith.mulf %39, %34 : vector<64x16xf32>
    %cst_21 = arith.constant 8.99999984E-4 : f32
    %41 = vector.broadcast %cst_21 : f32 to vector<64x16xf32>
    %42 = arith.addf %40, %41 : vector<64x16xf32>
    %43 = arith.mulf %38, %42 : vector<64x16xf32>
    %44 = arith.addf %29, %30 : vector<64x16xf32>
    %cst_22 = arith.constant 9.99999974E-5 : f32
    %45 = vector.broadcast %cst_22 : f32 to vector<64x16xf32>
    %46 = arith.addf %44, %45 : vector<64x16xf32>
    %47 = arith.addf %32, %33 : vector<64x16xf32>
    %cst_23 = arith.constant 8.99999984E-4 : f32
    %48 = vector.broadcast %cst_23 : f32 to vector<64x16xf32>
    %49 = arith.addf %47, %48 : vector<64x16xf32>
    %50 = arith.mulf %46, %49 : vector<64x16xf32>
    %51 = tpu.reciprocal %50 : vector<64x16xf32> -> vector<64x16xf32>
    %52 = arith.mulf %43, %51 : vector<64x16xf32>
    %53 = vector.shape_cast %52 : vector<64x16xf32> to vector<1x64x16xf32>
    %cst_24 = arith.constant dense<0.000000e+00> : vector<1xf32>
    %54 = vector.multi_reduction <add>, %53, %cst_24 [1, 2] : vector<1x64x16xf32> to vector<1xf32>
    %55 = vector.shape_cast %54 : vector<1xf32> to vector<1x1x1xf32>
    %56 = vector.extract %55[0, 0, 0] : f32 from vector<1x1x1xf32>
    %57 = vector.broadcast %56 : f32 to vector<1x1x1xf32>
    %c0_25 = arith.constant 0 : index
    %c0_26 = arith.constant 0 : index
    %c0_27 = arith.constant 0 : index
    %58 = vector.load %arg5[%c0_25, %c0_26, %c0_27] : memref<1x1x1xf32, #tpu.memory_space<vmem>>, vector<1x1x1xf32>
    tpu.vector_store %arg5[%c0_25, %c0_26, %c0_27], %57 {strides = array<i32>} : memref<1x1x1xf32, #tpu.memory_space<vmem>>, vector<1x1x1xf32>,
    return
  }
  func.func @transform_0(%arg0: i32) -> (i32, i32) {
    %c0_i32 = arith.constant 0 : i32
    %c0_i32_0 = arith.constant 0 : i32
    %c0_i32_1 = arith.constant 0 : i32
    return %c0_i32, %c0_i32_0 : i32, i32
  }
  func.func @transform_1(%arg0: i32) -> (i32, i32) {
    %c0_i32 = arith.constant 0 : i32
    %c0_i32_0 = arith.constant 0 : i32
    %c0_i32_1 = arith.constant 0 : i32
    return %c0_i32, %c0_i32_0 : i32, i32
  }
  func.func @transform_2(%arg0: i32) -> (i32, i32, i32) {
    %c0_i32 = arith.constant 0 : i32
    %c0_i32_0 = arith.constant 0 : i32
    %c0_i32_1 = arith.constant 0 : i32
    return %arg0, %c0_i32, %c0_i32_0 : i32, i32, i32
  }
  func.func @transform_3(%arg0: i32) -> (i32, i32, i32) {
    %c0_i32 = arith.constant 0 : i32
    %c0_i32_0 = arith.constant 0 : i32
    %c0_i32_1 = arith.constant 0 : i32
    return %arg0, %c0_i32, %c0_i32_0 : i32, i32, i32
  }
  func.func @transform_4(%arg0: i32) -> (i32, i32, i32) {
    %c0_i32 = arith.constant 0 : i32
    %c0_i32_0 = arith.constant 0 : i32
    %c0_i32_1 = arith.constant 0 : i32
    return %arg0, %c0_i32, %c0_i32_0 : i32, i32, i32
  }
}

</mosaic_0001>

<bundles_post_ra>
// kernel: tpu_custom_call.1
= control target key start
LH: loop header
LB: loop body
LE: loop exit
PB: predicated region body
PF: predicated region fallthrough
CT: control target
= control target key end

     0   :  { %s1956_s15 = smov 0   ;;  %s2302_s0 = inlined_call_operand.vmem [shape: f32[64,64], index: 0, kind: input, shape index: {}]   ;;  %s2303_s1 = inlined_call_operand.vmem [shape: f32[16,16], index: 1, kind: input, shape index: {}]   ;;  %s2304_s2 = inlined_call_operand.vmem [shape: f32[2,64,16], index: 2, kind: input, shape index: {}]   ;;  %s2305_s3 = inlined_call_operand.vmem [shape: f32[2,64,16], index: 3, kind: input, shape index: {}]   ;;  %s2306_s4 = inlined_call_operand.vmem [shape: f32[2,1,1], index: 4, kind: output, shape index: {}]  }
   0x1 LB: > { %s1462_s16 = sadd.s32 4294967295, %s1929_s15   ;;  %p1466_p0 = scmp.ge.s32.totalorder %s1929_s15, 1  ;;  %s1929_s15 = sphi %s1956_s15, %s14_s15  }
   0x2   : > { %p172_p1 = scmp.lt.s32.totalorder %s1929_s15, 3 }
   0x4   : > { %p173_p2 = pnand %p1466_p0, %p172_p1 }
   0x5   : > { %p201_p3 = scmp.lt.s32.totalorder (!%p173_p2), %s1462_s16, 1 }
   0x6   : > { %176 = sbr.rel (%p173_p2) target bundleno = 731 (0x2db), region = 36 }
   0xb   : > { %v271_v0 = vld [vmem:[%s2303_s1 + $0x8] sm:$0xff]  ;;  %v270_v1 = vld [vmem:[%s2303_s1] sm:$0xff]  ;;  %s2308_s16 = smov (!%p201_p3, %s1462_s16), 1  ;;  %vm296_vm0 = vcmask 130048   ;;  %vm682_vm1 = vcmask 523264   ;;  %vm1401_vm2 = vcmask 0  }
   0xc   : > { %1677 = vmatprep.subr.mxu0 %v271_v0  ;;  %s1553_s21 = sshll.u32 %s2308_s16, 6  ;;  %s213_s22 = scalar_lea.vmem %s2306_s4, %s2308_s16 }
   0xd   : > { %1678 = vmatpush3.msra.mxu0 %v271_v0  ;;  %s205_s24 = scalar_lea.vmem %s2304_s2, %s1553_s21  ;;  %s1985_s27 = scalar_lea.vmem %s2305_s3, %s1553_s21 }
   0xe   : > { %1679 = vmatprep.subr.mxu0 %v270_v1  ;;  %v214_v2 = vld [vmem:[%s205_s24] sm:$0xff]  ;;  %v215_v3 = vld [vmem:[%s205_s24 + $0x8] sm:$0xff]  ;;  %v216_v4 = vld [vmem:[%s205_s24 + $0x10] sm:$0xff] }
   0xf   : > { %1680 = vmatpush3.msra.mxu0 %v270_v1  ;;  %v222_v5 = vmul.f32 0.5, %v214_v2  ;;  %v223_v6 = vmul.f32 0.5, %v215_v3  ;;  %v224_v7 = vmul.f32 0.5, %v216_v4  ;;  %v217_v8 = vld [vmem:[%s205_s24 + $0x18] sm:$0xff]  ;;  %v218_v9 = vld [vmem:[%s205_s24 + $0x20] sm:$0xff]  ;;  %v219_v15 = vld [vmem:[%s205_s24 + $0x28] sm:$0xff] }
  0x10   : > { %v225_v10 = vmul.f32 0.5, %v217_v8  ;;  %v226_v14 = vmul.f32 0.5, %v218_v9  ;;  %v220_v16 = vld [vmem:[%s205_s24 + $0x30] sm:$0xff]  ;;  %v227_v18 = vmul.f32 0.5, %v219_v15  ;;  %v221_v21 = vld [vmem:[%s205_s24 + $0x38] sm:$0xff]  ;;  %v238_v22 = vld [vmem:[%s1985_s27] sm:$0xff] }
  0x11   : > { %v1976_v11 = vadd.f32 0.5, %v222_v5  ;;  %v1978_v12 = vadd.f32 0.5, %v223_v6  ;;  %v1980_v13 = vadd.f32 0.5, %v224_v7  ;;  %v228_v20 = vmul.f32 0.5, %v220_v16  ;;  %v239_v27 = vld [vmem:[%s1985_s27 + $0x8] sm:$0xff]  ;;  %v240_v28 = vld [vmem:[%s1985_s27 + $0x10] sm:$0xff] }
  0x12   : > { %v1991_v17 = vadd.f32 0.5, %v225_v10  ;;  %v1995_v19 = vadd.f32 0.5, %v226_v14  ;;  %v2000_v23 = vadd.f32 0.5, %v227_v18  ;;  %v229_v24 = vmul.f32 0.5, %v221_v21  ;;  %v241_v33 = vld [vmem:[%s1985_s27 + $0x18] sm:$0xff]  ;;  %v242_v34 = vld [vmem:[%s1985_s27 + $0x20] sm:$0xff] }
  0x13   : > { %1681 = vmatprep.mubr.msk.f32.mxu0 %vm296_vm0, %v1976_v11  ;;  %v2004_v25 = vadd.f32 0.5, %v228_v20  ;;  %v246_v26 = vmul.f32 0.5, %v238_v22  ;;  %v247_v30 = vmul.f32 0.5, %v239_v27  ;;  %v248_v32 = vmul.f32 0.5, %v240_v28  ;;  %v243_v39 = vld [vmem:[%s1985_s27 + $0x28] sm:$0xff]  ;;  %v244_v40 = vld [vmem:[%s1985_s27 + $0x30] sm:$0xff] }
  0x14   : > { %1682 = vmatmul.mubr.msk.f32.vlgmr.msra.gmra.mxu0 %vm296_vm0, %v1978_v12  ;;  %v2010_v29 = vadd.f32 0.5, %v229_v24  ;;  %v249_v36 = vmul.f32 0.5, %v241_v33  ;;  %v250_v38 = vmul.f32 0.5, %v242_v34  ;;  %v251_v42 = vmul.f32 0.5, %v243_v39  ;;  %v245_v45 = vld [vmem:[%s1985_s27 + $0x38] sm:$0xff]  ;;  %v2080_v10 = vld [vmem:[%s2302_s0] sm:$0xff] }
  0x15   : > { %1684 = vmatprep.mubr.msk.f32.mxu0 %vm296_vm0, %v1980_v13  ;;  %v254_v31 = vadd.f32 0.5, %v246_v26  ;;  %v255_v35 = vadd.f32 0.5, %v247_v30  ;;  %v256_v37 = vadd.f32 0.5, %v248_v32  ;;  %v252_v44 = vmul.f32 0.5, %v244_v40  ;;  %1757 = vmatprep.mubr.msk.f32.mxu1 %vm682_vm1, %v2080_v10  ;;  %v2094_v26 = vld [vmem:[%s2302_s0 + $0x10] sm:$0xff]  ;;  %v2108_v30 = vld [vmem:[%s2302_s0 + $0x20] sm:$0xff] }
  0x16   : > { %v257_v41 = vadd.f32 0.5, %v249_v36  ;;  %v258_v43 = vadd.f32 0.5, %v250_v38  ;;  %v259_v46 = vadd.f32 0.5, %v251_v42  ;;  %v253_v47 = vmul.f32 0.5, %v245_v45  ;;  %v2117_v33 = vld [vmem:[%s2302_s0 + $0x28] sm:$0xff]  ;;  %v2122_v34 = vld [vmem:[%s2302_s0 + $0x30] sm:$0xff] }
  0x17   : > { %v260_v48 = vadd.f32 0.5, %v252_v44  ;;  %v272_v50 = vmul.f32 %v1976_v11, %v1976_v11  ;;  %v273_v51 = vmul.f32 %v1978_v12, %v1978_v12  ;;  %v274_v52 = vmul.f32 %v1980_v13, %v1980_v13 }
  0x18   : > { %1685 = vmatmul.mubr.msk.f32.gmra.mxu0 %vm296_vm0, %v1991_v17  ;;  %v261_v49 = vadd.f32 0.5, %v253_v47  ;;  %v275_v53 = vmul.f32 %v1991_v17, %v1991_v17  ;;  %v276_v54 = vmul.f32 %v1995_v19, %v1995_v19  ;;  %v277_v55 = vmul.f32 %v2000_v23, %v2000_v23 }
  0x19   : > { %1687 = vmatprep.mubr.msk.f32.mxu0 %vm296_vm0, %v1995_v19  ;;  %v278_v56 = vmul.f32 %v2004_v25, %v2004_v25  ;;  %v279_v57 = vmul.f32 %v2010_v29, %v2010_v29  ;;  %v280_v58 = vmul.f32 %v254_v31, %v254_v31  ;;  %v281_v59 = vmul.f32 %v255_v35, %v255_v35 }
  0x1a   : > { %v282_v60 = vmul.f32 %v256_v37, %v256_v37  ;;  %v283_v61 = vmul.f32 %v257_v41, %v257_v41  ;;  %v284_v62 = vmul.f32 %v258_v43, %v258_v43  ;;  %v285_v63 = vmul.f32 %v259_v46, %v259_v46 }
  0x1b   : > { %v286_v0 = vmul.f32 %v260_v48, %v260_v48  ;;  %v287_v1 = vmul.f32 %v261_v49, %v261_v49  ;;  %v288_v2 = vmul.f32 %v254_v31, %v1976_v11  ;;  %v289_v3 = vmul.f32 %v255_v35, %v1978_v12 }
  0x1c   : > { %1688 = vmatmul.mubr.msk.f32.gmra.mxu0 %vm296_vm0, %v2000_v23  ;;  %v290_v4 = vmul.f32 %v256_v37, %v1980_v13  ;;  %v291_v5 = vmul.f32 %v257_v41, %v1991_v17  ;;  %v292_v6 = vmul.f32 %v258_v43, %v1995_v19  ;;  %v293_v7 = vmul.f32 %v259_v46, %v2000_v23 }
  0x1d   : > { %1690 = vmatprep.mubr.msk.f32.mxu0 %vm296_vm0, %v2004_v25  ;;  %v294_v8 = vmul.f32 %v260_v48, %v2004_v25  ;;  %v295_v9 = vmul.f32 %v261_v49, %v2010_v29  ;;  %v2089_v25 = vld [vmem:[%s2302_s0 + $0x8] sm:$0xff] }
  0x20   : > { %1691 = vmatmul.mubr.msk.f32.gmra.mxu0 %vm296_vm0, %v2010_v29  ;;  %v2103_v29 = vld [vmem:[%s2302_s0 + $0x18] sm:$0xff] }
  0x21   : > { %1693 = vmatprep.mubr.msk.f32.mxu0 %vm296_vm0, %v254_v31 }
  0x24   : > { %1694 = vmatmul.mubr.msk.f32.gmra.mxu0 %vm296_vm0, %v255_v35 }
  0x25   : > { %1696 = vmatprep.mubr.msk.f32.mxu0 %vm296_vm0, %v256_v37  ;;  %v2131_v37 = vld [vmem:[%s2302_s0 + $0x38] sm:$0xff] }
  0x28   : > { %1697 = vmatmul.mubr.msk.f32.gmra.mxu0 %vm296_vm0, %v257_v41 }
  0x29   : > { %1699 = vmatprep.mubr.msk.f32.mxu0 %vm296_vm0, %v258_v43 }
  0x2c   : > { %1700 = vmatmul.mubr.msk.f32.gmra.mxu0 %vm296_vm0, %v259_v46 }
  0x2d   : > { %1702 = vmatprep.mubr.msk.f32.mxu0 %vm296_vm0, %v260_v48 }
  0x30   : > { %1703 = vmatmul.mubr.msk.f32.gmra.mxu0 %vm296_vm0, %v261_v49 }
  0x31   : > { %1705 = vmatprep.mubr.msk.f32.mxu0 %vm296_vm0, %v272_v50 }
  0x34   : > { %1706 = vmatmul.mubr.msk.f32.gmra.mxu0 %vm296_vm0, %v273_v51 }
  0x35   : > { %1708 = vmatprep.mubr.msk.f32.mxu0 %vm296_vm0, %v274_v52 }
  0x38   : > { %1709 = vmatmul.mubr.msk.f32.gmra.mxu0 %vm296_vm0, %v275_v53 }
  0x39   : > { %1711 = vmatprep.mubr.msk.f32.mxu0 %vm296_vm0, %v276_v54 }
  0x3c   : > { %1712 = vmatmul.mubr.msk.f32.gmra.mxu0 %vm296_vm0, %v277_v55 }
  0x3d   : > { %1714 = vmatprep.mubr.msk.f32.mxu0 %vm296_vm0, %v278_v56 }
  0x40   : > { %1715 = vmatmul.mubr.msk.f32.gmra.mxu0 %vm296_vm0, %v279_v57 }
  0x41   : > { %1717 = vmatprep.mubr.msk.f32.mxu0 %vm296_vm0, %v280_v58 }
  0x44   : > { %1718 = vmatmul.mubr.msk.f32.gmra.mxu0 %vm296_vm0, %v281_v59 }
  0x45   : > { %1720 = vmatprep.mubr.msk.f32.mxu0 %vm296_vm0, %v282_v60 }
  0x48   : > { %1721 = vmatmul.mubr.msk.f32.gmra.mxu0 %vm296_vm0, %v283_v61 }
  0x49   : > { %1723 = vmatprep.mubr.msk.f32.mxu0 %vm296_vm0, %v284_v62 }
  0x4c   : > { %1724 = vmatmul.mubr.msk.f32.gmra.mxu0 %vm296_vm0, %v285_v63 }
  0x4d   : > { %1726 = vmatprep.mubr.msk.f32.mxu0 %vm296_vm0, %v286_v0 }
  0x50   : > { %1727 = vmatmul.mubr.msk.f32.gmra.mxu0 %vm296_vm0, %v287_v1 }
  0x51   : > { %1729 = vmatprep.mubr.msk.f32.mxu0 %vm296_vm0, %v288_v2 }
  0x54   : > { %1730 = vmatmul.mubr.msk.f32.gmra.mxu0 %vm296_vm0, %v289_v3 }
  0x55   : > { %1732 = vmatprep.mubr.msk.f32.mxu0 %vm296_vm0, %v290_v4 }
  0x58   : > { %1733 = vmatmul.mubr.msk.f32.gmra.mxu0 %vm296_vm0, %v291_v5 }
  0x59   : > { %1735 = vmatprep.mubr.msk.f32.mxu0 %vm296_vm0, %v292_v6 }
  0x5c   : > { %1736 = vmatmul.mubr.msk.f32.gmra.mxu0 %vm296_vm0, %v293_v7 }
  0x5d   : > { %1738 = vmatprep.mubr.msk.f32.mxu0 %vm296_vm0, %v294_v8 }
  0x60   : > { %1739 = vmatmul.mubr.msk.f32.gmra.mxu0 %vm296_vm0, %v295_v9 }
  0x61   : > { %1869 = vmatprep.mubr.msk.f32.mxu0 %vm682_vm1, %v2080_v10 }
  0xd4   : > { %v1683_v11 = vpop.f32.mrf.mxu0 }
  0xd6   : > { %v483_v12 = vpop.f32.mrf.mxu0 }
  0xd8   : > { %v1686_v13 = vpop.f32.mrf.mxu0 }
  0xda   : > { %v493_v14 = vpop.f32.mrf.mxu0 }
  0xdc   : > { %v1689_v15 = vpop.f32.mrf.mxu0 }
  0xde   : > { %v503_v16 = vpop.f32.mrf.mxu0 }
  0xe0   : > { %v1692_v17 = vpop.f32.mrf.mxu0 }
  0xe1   : > { %1741 = vmatprep.subr.mxu1 %v1692_v17 }
  0xe2   : > { %v513_v18 = vpop.f32.mrf.mxu0  ;;  %1742 = vmatpush3.msra.mxu1 %v1692_v17 }
  0xe3   : > { %1743 = vmatprep.subr.mxu1 %v513_v18 }
  0xe4   : > { %v1695_v19 = vpop.f32.mrf.mxu0  ;;  %1744 = vmatpush3.msra.mxu1 %v513_v18 }
  0xe5   : > { %1745 = vmatprep.subr.mxu1 %v1689_v15 }
  0xe6   : > { %v523_v20 = vpop.f32.mrf.mxu0  ;;  %1746 = vmatpush3.msra.mxu1 %v1689_v15 }
  0xe7   : > { %1747 = vmatprep.subr.mxu1 %v503_v16 }
  0xe8   : > { %v1698_v21 = vpop.f32.mrf.mxu0  ;;  %1748 = vmatpush3.msra.mxu1 %v503_v16 }
  0xe9   : > { %1749 = vmatprep.subr.mxu1 %v1686_v13 }
  0xea   : > { %v533_v22 = vpop.f32.mrf.mxu0  ;;  %1750 = vmatpush3.msra.mxu1 %v1686_v13 }
  0xeb   : > { %1751 = vmatprep.subr.mxu1 %v493_v14 }
  0xec   : > { %v1701_v23 = vpop.f32.mrf.mxu0  ;;  %1752 = vmatpush3.msra.mxu1 %v493_v14 }
  0xed   : > { %1753 = vmatprep.subr.mxu1 %v1683_v11 }
  0xee   : > { %v543_v24 = vpop.f32.mrf.mxu0  ;;  %1754 = vmatpush3.msra.mxu1 %v1683_v11 }
  0xef   : > { %1755 = vmatprep.subr.mxu1 %v483_v12 }
  0xf0   : > { %v1704_v27 = vpop.f32.mrf.mxu0  ;;  %1756 = vmatpush3.msra.mxu1 %v483_v12 }
  0xf1   : > { %1758 = vmatmul.mubr.msk.f32.vlgmr.msra.gmra.mxu1 %vm682_vm1, %v2089_v25  ;;  %1769 = vmatprep.subr.mxu1 %v1704_v27 }
  0xf2   : > { %v553_v28 = vpop.f32.mrf.mxu0  ;;  %1770 = vmatpush3.msra.mxu1 %v1704_v27  ;;  %1760 = vmatprep.mubr.msk.f32.mxu1 %vm682_vm1, %v2094_v26 }
  0xf3   : > { %1771 = vmatprep.subr.mxu1 %v553_v28 }
  0xf4   : > { %v1707_v31 = vpop.f32.mrf.mxu0  ;;  %1772 = vmatpush3.msra.mxu1 %v553_v28 }
  0xf5   : > { %1761 = vmatmul.mubr.msk.f32.gmra.mxu1 %vm682_vm1, %v2103_v29  ;;  %1773 = vmatprep.subr.mxu1 %v1701_v23 }
  0xf6   : > { %v563_v32 = vpop.f32.mrf.mxu0  ;;  %1774 = vmatpush3.msra.mxu1 %v1701_v23  ;;  %1763 = vmatprep.mubr.msk.f32.mxu1 %vm682_vm1, %v2108_v30 }
  0xf7   : > { %1775 = vmatprep.subr.mxu1 %v543_v24 }
  0xf8   : > { %v1710_v35 = vpop.f32.mrf.mxu0  ;;  %1776 = vmatpush3.msra.mxu1 %v543_v24 }
  0xf9   : > { %1764 = vmatmul.mubr.msk.f32.gmra.mxu1 %vm682_vm1, %v2117_v33  ;;  %1777 = vmatprep.subr.mxu1 %v1698_v21 }
  0xfa   : > { %v573_v36 = vpop.f32.mrf.mxu0  ;;  %1778 = vmatpush3.msra.mxu1 %v1698_v21  ;;  %1766 = vmatprep.mubr.msk.f32.mxu1 %vm682_vm1, %v2122_v34 }
  0xfb   : > { %1779 = vmatprep.subr.mxu1 %v533_v22 }
  0xfc   : > { %v1713_v38 = vpop.f32.mrf.mxu0  ;;  %1780 = vmatpush3.msra.mxu1 %v533_v22 }
  0xfd   : > { %1767 = vmatmul.mubr.msk.f32.gmra.mxu1 %vm682_vm1, %v2131_v37  ;;  %1781 = vmatprep.subr.mxu1 %v1695_v19 }
  0xfe   : > { %v583_v39 = vpop.f32.mrf.mxu0  ;;  %1782 = vmatpush3.msra.mxu1 %v1695_v19  ;;  %1785 = vmatprep.mubr.msk.f32.mxu1 %vm682_vm1, %v2080_v10 }
  0xff   : > { %1783 = vmatprep.subr.mxu1 %v523_v20 }
 0x100   : > { %v1716_v40 = vpop.f32.mrf.mxu0  ;;  %1784 = vmatpush3.msra.mxu1 %v523_v20 }
 0x101   : > { %1786 = vmatmul.mubr.msk.f32.vlgmr.msra.gmra.mxu1 %vm682_vm1, %v2089_v25  ;;  %1797 = vmatprep.subr.mxu1 %v1716_v40 }
 0x102   : > { %v593_v41 = vpop.f32.mrf.mxu0  ;;  %1798 = vmatpush3.msra.mxu1 %v1716_v40  ;;  %1788 = vmatprep.mubr.msk.f32.mxu1 %vm682_vm1, %v2094_v26 }
 0x103   : > { %1799 = vmatprep.subr.mxu1 %v593_v41 }
 0x104   : > { %v1719_v42 = vpop.f32.mrf.mxu0  ;;  %1800 = vmatpush3.msra.mxu1 %v593_v41 }
 0x105   : > { %1789 = vmatmul.mubr.msk.f32.gmra.mxu1 %vm682_vm1, %v2103_v29  ;;  %1801 = vmatprep.subr.mxu1 %v1713_v38 }
 0x106   : > { %v603_v43 = vpop.f32.mrf.mxu0  ;;  %1802 = vmatpush3.msra.mxu1 %v1713_v38  ;;  %1791 = vmatprep.mubr.msk.f32.mxu1 %vm682_vm1, %v2108_v30 }
 0x107   : > { %1803 = vmatprep.subr.mxu1 %v583_v39 }
 0x108   : > { %v1722_v44 = vpop.f32.mrf.mxu0  ;;  %1804 = vmatpush3.msra.mxu1 %v583_v39 }
 0x109   : > { %1792 = vmatmul.mubr.msk.f32.gmra.mxu1 %vm682_vm1, %v2117_v33  ;;  %1805 = vmatprep.subr.mxu1 %v1710_v35 }
 0x10a   : > { %v613_v45 = vpop.f32.mrf.mxu0  ;;  %1806 = vmatpush3.msra.mxu1 %v1710_v35  ;;  %1794 = vmatprep.mubr.msk.f32.mxu1 %vm682_vm1, %v2122_v34 }
 0x10b   : > { %1807 = vmatprep.subr.mxu1 %v573_v36 }
 0x10c   : > { %v1725_v46 = vpop.f32.mrf.mxu0  ;;  %1808 = vmatpush3.msra.mxu1 %v573_v36 }
 0x10d   : > { %1795 = vmatmul.mubr.msk.f32.gmra.mxu1 %vm682_vm1, %v2131_v37  ;;  %1809 = vmatprep.subr.mxu1 %v1707_v31 }
 0x10e   : > { %v623_v47 = vpop.f32.mrf.mxu0  ;;  %1810 = vmatpush3.msra.mxu1 %v1707_v31  ;;  %1813 = vmatprep.mubr.msk.f32.mxu1 %vm682_vm1, %v2080_v10 }
 0x10f   : > { %1811 = vmatprep.subr.mxu1 %v563_v32 }
 0x110   : > { %v1728_v48 = vpop.f32.mrf.mxu0  ;;  %1812 = vmatpush3.msra.mxu1 %v563_v32 }
 0x111   : > { %1814 = vmatmul.mubr.msk.f32.vlgmr.msra.gmra.mxu1 %vm682_vm1, %v2089_v25  ;;  %1825 = vmatprep.subr.mxu1 %v1728_v48 }
 0x112   : > { %v633_v49 = vpop.f32.mrf.mxu0  ;;  %1826 = vmatpush3.msra.mxu1 %v1728_v48  ;;  %1816 = vmatprep.mubr.msk.f32.mxu1 %vm682_vm1, %v2094_v26 }
 0x113   : > { %1827 = vmatprep.subr.mxu1 %v633_v49 }
 0x114   : > { %v1731_v50 = vpop.f32.mrf.mxu0  ;;  %1828 = vmatpush3.msra.mxu1 %v633_v49 }
 0x115   : > { %1817 = vmatmul.mubr.msk.f32.gmra.mxu1 %vm682_vm1, %v2103_v29  ;;  %1829 = vmatprep.subr.mxu1 %v1725_v46 }
 0x116   : > { %v643_v51 = vpop.f32.mrf.mxu0  ;;  %1830 = vmatpush3.msra.mxu1 %v1725_v46  ;;  %1819 = vmatprep.mubr.msk.f32.mxu1 %vm682_vm1, %v2108_v30 }
 0x117   : > { %1831 = vmatprep.subr.mxu1 %v623_v47 }
 0x118   : > { %v1734_v52 = vpop.f32.mrf.mxu0  ;;  %1832 = vmatpush3.msra.mxu1 %v623_v47 }
 0x119   : > { %1820 = vmatmul.mubr.msk.f32.gmra.mxu1 %vm682_vm1, %v2117_v33  ;;  %1833 = vmatprep.subr.mxu1 %v1722_v44 }
 0x11a   : > { %v653_v53 = vpop.f32.mrf.mxu0  ;;  %1834 = vmatpush3.msra.mxu1 %v1722_v44  ;;  %1822 = vmatprep.mubr.msk.f32.mxu1 %vm682_vm1, %v2122_v34 }
 0x11b   : > { %1835 = vmatprep.subr.mxu1 %v613_v45 }
 0x11c   : > { %v1737_v54 = vpop.f32.mrf.mxu0  ;;  %1836 = vmatpush3.msra.mxu1 %v613_v45 }
 0x11d   : > { %1823 = vmatmul.mubr.msk.f32.gmra.mxu1 %vm682_vm1, %v2131_v37  ;;  %1837 = vmatprep.subr.mxu1 %v1719_v42 }
 0x11e   : > { %v663_v55 = vpop.f32.mrf.mxu0  ;;  %1838 = vmatpush3.msra.mxu1 %v1719_v42  ;;  %1841 = vmatprep.mubr.msk.f32.mxu1 %vm682_vm1, %v2080_v10 }
 0x11f   : > { %1839 = vmatprep.subr.mxu1 %v603_v43 }
 0x120   : > { %v1740_v56 = vpop.f32.mrf.mxu0  ;;  %1840 = vmatpush3.msra.mxu1 %v603_v43 }
 0x121   : > { %1842 = vmatmul.mubr.msk.f32.vlgmr.msra.gmra.mxu1 %vm682_vm1, %v2089_v25  ;;  %1853 = vmatprep.subr.mxu0 %v1740_v56 }
 0x122   : > { %1881 = vmatprep.subr.mxu1 %v1740_v56  ;;  %v673_v57 = vpop.f32.mrf.mxu0  ;;  %1854 = vmatpush3.msra.mxu0 %v1740_v56 }
 0x123   : > { %1889 = vmatpush3.msra.mxu1 %v1740_v56  ;;  %1855 = vmatprep.subr.mxu0 %v673_v57 }
 0x124   : > { %1882 = vmatprep.subr.mxu1 %v673_v57  ;;  %1844 = vmatprep.mubr.msk.f32.mxu1 %vm682_vm1, %v2094_v26 }
 0x125   : > { %1856 = vmatpush3.msra.mxu0 %v673_v57  ;;  %1890 = vmatpush3.msra.mxu1 %v673_v57 }
 0x126   : > { %1845 = vmatmul.mubr.msk.f32.gmra.mxu1 %vm682_vm1, %v2103_v29  ;;  %1857 = vmatprep.subr.mxu0 %v1737_v54 }
 0x127   : > { %1883 = vmatprep.subr.mxu1 %v1737_v54  ;;  %1858 = vmatpush3.msra.mxu0 %v1737_v54 }
 0x128   : > { %1891 = vmatpush3.msra.mxu1 %v1737_v54  ;;  %1859 = vmatprep.subr.mxu0 %v663_v55 }
 0x129   : > { %1884 = vmatprep.subr.mxu1 %v663_v55  ;;  %1847 = vmatprep.mubr.msk.f32.mxu1 %vm682_vm1, %v2108_v30 }
 0x12a   : > { %1860 = vmatpush3.msra.mxu0 %v663_v55  ;;  %1892 = vmatpush3.msra.mxu1 %v663_v55 }
 0x12b   : > { %1848 = vmatmul.mubr.msk.f32.gmra.mxu1 %vm682_vm1, %v2117_v33  ;;  %1861 = vmatprep.subr.mxu0 %v1734_v52 }
 0x12c   : > { %1885 = vmatprep.subr.mxu1 %v1734_v52  ;;  %1862 = vmatpush3.msra.mxu0 %v1734_v52 }
 0x12d   : > { %1893 = vmatpush3.msra.mxu1 %v1734_v52  ;;  %1863 = vmatprep.subr.mxu0 %v653_v53 }
 0x12e   : > { %1886 = vmatprep.subr.mxu1 %v653_v53  ;;  %1850 = vmatprep.mubr.msk.f32.mxu1 %vm682_vm1, %v2122_v34 }
 0x12f   : > { %1864 = vmatpush3.msra.mxu0 %v653_v53  ;;  %1894 = vmatpush3.msra.mxu1 %v653_v53 }
 0x130   : > { %1851 = vmatmul.mubr.msk.f32.gmra.mxu1 %vm682_vm1, %v2131_v37  ;;  %1865 = vmatprep.subr.mxu0 %v1731_v50 }
 0x131   : > { %1887 = vmatprep.subr.mxu1 %v1731_v50  ;;  %1866 = vmatpush3.msra.mxu0 %v1731_v50 }
 0x132   : > { %1895 = vmatpush3.msra.mxu1 %v1731_v50  ;;  %1867 = vmatprep.subr.mxu0 %v643_v51 }
 0x133   : > { %1888 = vmatprep.subr.mxu1 %v643_v51  ;;  %1868 = vmatpush3.msra.mxu0 %v643_v51 }
 0x134   : > { %1896 = vmatpush3.msra.mxu1 %v643_v51  ;;  %1870 = vmatmul.mubr.msk.f32.vlgmr.msra.gmra.mxu0 %vm682_vm1, %v2089_v25 }
 0x135   : > { %1872 = vmatprep.mubr.msk.f32.mxu1 %vm682_vm1, %v2094_v26 }
 0x136   : > { %1873 = vmatmul.mubr.msk.f32.vlgmr.msra.gmra.mxu1 %vm682_vm1, %v2103_v29 }
 0x137   : > { %1875 = vmatprep.mubr.msk.f32.mxu1 %vm682_vm1, %v2108_v30 }
 0x13a   : > { %1876 = vmatmul.mubr.msk.f32.gmra.mxu1 %vm682_vm1, %v2117_v33 }
 0x13b   : > { %1878 = vmatprep.mubr.msk.f32.mxu1 %vm682_vm1, %v2122_v34 }
 0x13e   : > { %1879 = vmatmul.mubr.msk.f32.gmra.mxu1 %vm682_vm1, %v2131_v37 }
 0x1b1   : > { %v1759_v58 = vpop.f32.mrf.mxu1 }
 0x1b2   : > { %v1233_v20 = vmul.f32 %v1759_v58, %v1759_v58 }
 0x1b3   : > { %v773_v59 = vpop.f32.mrf.mxu1 }
 0x1b4   : > { %v1232_v21 = vmul.f32 %v773_v59, %v773_v59 }
 0x1b5   : > { %v2197_v60 = vpop.f32.mrf.mxu1 }
 0x1b6   : > { %v1235_v27 = vmul.f32 %v2197_v60, %v2197_v60 }
 0x1b7   : > { %v2199_v61 = vpop.f32.mrf.mxu1 }
 0x1b8   : > { %v1234_v28 = vmul.f32 %v2199_v61, %v2199_v61 }
 0x1b9   : > { %v2201_v62 = vpop.f32.mrf.mxu1 }
 0x1ba   : > { %v1237_v36 = vmul.f32 %v2201_v62, %v2201_v62 }
 0x1bb   : > { %v2203_v63 = vpop.f32.mrf.mxu1 }
 0x1bc   : > { %v1236_v37 = vmul.f32 %v2203_v63, %v2203_v63 }
 0x1bd   : > { %v2205_v0 = vpop.f32.mrf.mxu1 }
 0x1be   : > { %v2242_v38 = vmul.f32 %v2205_v0, %v2205_v0 }
 0x1bf   : > { %v2207_v1 = vpop.f32.mrf.mxu1 }
 0x1c0   : > { %v2246_v39 = vmul.f32 %v2207_v1, %v2207_v1 }
 0x1c1   : > { %v1787_v2 = vpop.f32.mrf.mxu1 }
 0x1c2   : > { %v1241_v17 = vmul.f32 %v1787_v2, %v1787_v2  ;;  %v2225_v18 = vmul.f32 %v1787_v2, %v1759_v58 }
 0x1c3   : > { %v878_v3 = vpop.f32.mrf.mxu1 }
 0x1c4   : > { %v1240_v23 = vmul.f32 %v878_v3, %v878_v3  ;;  %v1281_v29 = vmul.f32 2.0, %v2225_v18  ;;  %v1321_v30 = vadd.f32 %v1241_v17, %v1233_v20  ;;  %v2248_v40 = vmul.f32 %v878_v3, %v773_v59 }
 0x1c5   : > { %v1790_v4 = vpop.f32.mrf.mxu1 }
 0x1c6   : > { %v1243_v24 = vmul.f32 %v1790_v4, %v1790_v4  ;;  %v1320_v41 = vadd.f32 %v1240_v23, %v1232_v21  ;;  %v2252_v49 = vadd.f32 0.0001, %v1281_v29  ;;  %v1329_v50 = vadd.f32 0.0001, %v1321_v30 }
 0x1c7   : > { %v2209_v5 = vpop.f32.mrf.mxu1  ;;  %v1280_v58 = vmul.f32 2.0, %v2248_v40  ;;  %v2258_v2 = vmul.f32 %v1790_v4, %v2197_v60 }
 0x1c8   : > { %v1242_v32 = vmul.f32 %v2209_v5, %v2209_v5  ;;  %v1323_v42 = vadd.f32 %v1243_v24, %v1235_v27  ;;  %v1328_v59 = vadd.f32 0.0001, %v1320_v41 }
 0x1c9   : > { %v2211_v6 = vpop.f32.mrf.mxu1 }
 0x1ca   : > { %v1245_v45 = vmul.f32 %v2211_v6, %v2211_v6  ;;  %v1322_v51 = vadd.f32 %v1242_v32, %v1234_v28  ;;  %v1331_v3 = vadd.f32 0.0001, %v1323_v42 }
 0x1cb   : > { %v2213_v7 = vpop.f32.mrf.mxu1 }
 0x1cc   : > { %v1244_v54 = vmul.f32 %v2213_v7, %v2213_v7 }
 0x1cd   : > { %v2215_v8 = vpop.f32.mrf.mxu1 }
 0x1cf   : > { %v2217_v9 = vpop.f32.mrf.mxu1 }
 0x1d0   : > { %v1246_v60 = vmul.f32 %v2217_v9, %v2217_v9 }
 0x1d1   : > { %v1815_v10 = vpop.f32.mrf.mxu1 }
 0x1d2   : > { %v1257_v25 = vsub.f32 %v1815_v10, %v1233_v20  ;;  %v1325_v10 = vadd.f32 %v1245_v45, %v1237_v36 }
 0x1d3   : > { %v983_v11 = vpop.f32.mrf.mxu1 }
 0x1d4   : > { %v1256_v33 = vsub.f32 %v983_v11, %v1232_v21  ;;  %v1247_v21 = vmul.f32 %v2215_v8, %v2215_v8 }
 0x1d5   : > { %v1818_v12 = vpop.f32.mrf.mxu1 }
 0x1d6   : > { %v1259_v46 = vsub.f32 %v1818_v12, %v1235_v27 }
 0x1d7   : > { %v993_v13 = vpop.f32.mrf.mxu1 }
 0x1d8   : > { %v1258_v55 = vsub.f32 %v993_v13, %v1234_v28 }
 0x1d9   : > { %v2219_v14 = vpop.f32.mrf.mxu1 }
 0x1db   : > { %v2221_v15 = vpop.f32.mrf.mxu1 }
 0x1dc   : > { %v1260_v4 = vsub.f32 %v2221_v15, %v1236_v37 }
 0x1dd   : > { %v2223_v16 = vpop.f32.mrf.mxu1 }
 0x1de   : > { %v1263_v42 = vsub.f32 %v2223_v16, %v2242_v38  ;;  %v1252_v16 = vmul.f32 %v2213_v7, %v2203_v63 }
 0x1df   : > { %v2227_v19 = vpop.f32.mrf.mxu1 }
 0x1e1   : > { %v1843_v22 = vpop.f32.mrf.mxu1 }
 0x1e2   : > { %v1265_v26 = vsub.f32 %v1843_v22, %v1241_v17  ;;  %v1261_v22 = vsub.f32 %v2219_v14, %v1237_v36 }
 0x1e3   : > { %v1088_v31 = vpop.f32.mrf.mxu1 }
 0x1e4   : > { %v1337_v34 = vadd.f32 %v1265_v26, %v1257_v25  ;;  %v1264_v35 = vsub.f32 %v1088_v31, %v1240_v23  ;;  %v1324_v25 = vadd.f32 %v1244_v54, %v1236_v37  ;;  %v1250_v31 = vmul.f32 %v2209_v5, %v2199_v61 }
 0x1e5   : > { %v1326_v37 = vadd.f32 %v1246_v60, %v2246_v39 }
 0x1e6   : > { %v1336_v43 = vadd.f32 %v1264_v35, %v1256_v33  ;;  %v1846_v44 = vpop.f32.mrf.mxu1  ;;  %v1345_v47 = vadd.f32 0.0009, %v1337_v34  ;;  %v1327_v33 = vadd.f32 %v1247_v21, %v2242_v38  ;;  %v1332_v41 = vadd.f32 0.0001, %v1324_v25 }
 0x1e7   : > { %v1267_v48 = vsub.f32 %v1846_v44, %v1243_v24  ;;  %v1330_v24 = vadd.f32 0.0001, %v1322_v51  ;;  %v1283_v44 = vmul.f32 2.0, %v2258_v2 }
 0x1e8   : > { %v1344_v52 = vadd.f32 0.0009, %v1336_v43  ;;  %v1098_v53 = vpop.f32.mrf.mxu1  ;;  %v1353_v11 = vmul.f32 %v1345_v47, %v1329_v50  ;;  %v1335_v38 = vadd.f32 0.0001, %v1327_v33 }
 0x1e9   : > { %v1339_v56 = vadd.f32 %v1267_v48, %v1259_v46  ;;  %v1266_v57 = vsub.f32 %v1098_v53, %v1242_v32  ;;  %v1333_v32 = vadd.f32 0.0001, %v1325_v10  ;;  %v1253_v48 = vmul.f32 %v2211_v6, %v2201_v62 }
 0x1ea   : > { %v1352_v13 = vmul.f32 %v1344_v52, %v1328_v59  ;;  %1907 = vrcp.f32 %v1353_v11  ;;  %v1291_v63 = vadd.f32 0.0001, %v1283_v44  ;;  %v1255_v10 = vmul.f32 %v2215_v8, %v2205_v0 }
 0x1eb   : > { %v1347_v12 = vadd.f32 0.0009, %v1339_v56  ;;  %v1338_v17 = vadd.f32 %v1266_v57, %v1258_v55  ;;  %v1849_v20 = vpop.f32.mrf.mxu1  ;;  %v1288_v55 = vadd.f32 0.0001, %v1280_v58  ;;  %v1282_v56 = vmul.f32 2.0, %v1250_v31 }
 0x1ec   : > { %v1269_v23 = vsub.f32 %v1849_v20, %v1245_v45  ;;  %1909 = vrcp.f32 %v1352_v13  ;;  %v1262_v45 = vsub.f32 %v2227_v19, %v2246_v39  ;;  %v1334_v57 = vadd.f32 0.0001, %v1326_v37 }
 0x1ed   : > { %v1355_v26 = vmul.f32 %v1347_v12, %v1331_v3  ;;  %v1346_v27 = vadd.f32 0.0009, %v1338_v17  ;;  %v1108_v28 = vpop.f32.mrf.mxu1  ;;  %v1285_v7 = vmul.f32 2.0, %v1253_v48  ;;  %v1290_v8 = vadd.f32 0.0001, %v1282_v56 }
 0x1ee   : > { %v1341_v29 = vadd.f32 %v1269_v23, %v1261_v22  ;;  %v1268_v30 = vsub.f32 %v1108_v28, %v1244_v54 }
 0x1ef   : > { %v1354_v14 = vmul.f32 %v1346_v27, %v1330_v24  ;;  %1911 = vrcp.f32 %v1355_v26 }
 0x1f0   : > { %v1349_v34 = vadd.f32 0.0009, %v1341_v29  ;;  %v1340_v35 = vadd.f32 %v1268_v30, %v1260_v4  ;;  %v1852_v36 = vpop.f32.mrf.mxu1 }
 0x1f1   : > { %v1271_v15 = vsub.f32 %v1852_v36, %v1247_v21  ;;  %1913 = vrcp.f32 %v1354_v14  ;;  %v1254_v21 = vmul.f32 %v2217_v9, %v2207_v1  ;;  %v1293_v9 = vadd.f32 0.0001, %v1285_v7 }
 0x1f2   : > { %v1357_v43 = vmul.f32 %v1349_v34, %v1333_v32  ;;  %v1348_v61 = vadd.f32 0.0009, %v1340_v35  ;;  %v1118_v5 = vpop.f32.mrf.mxu1  ;;  %v1287_v32 = vmul.f32 2.0, %v1255_v10 }
 0x1f3   : > { %v1343_v46 = vadd.f32 %v1271_v15, %v1263_v42  ;;  %v1270_v47 = vsub.f32 %v1118_v5, %v1246_v60 }
 0x1f4   : > { %v1356_v50 = vmul.f32 %v1348_v61, %v1332_v41  ;;  %v1871_v51 = vpop.f32.mrf.mxu0  ;;  %1915 = vrcp.f32 %v1357_v43 }
 0x1f5   : > { %v1351_v52 = vadd.f32 0.0009, %v1343_v46  ;;  %v1342_v53 = vadd.f32 %v1270_v47, %v1262_v45  ;;  %v1273_v54 = vsub.f32 %v1871_v51, %v2225_v18  ;;  %v1284_v18 = vmul.f32 2.0, %v1252_v16 }
 0x1f6   : > { %1917 = vrcp.f32 %v1356_v50  ;;  %v1193_v19 = vpop.f32.mrf.mxu0  ;;  %v1874_v39 = vpop.f32.mrf.mxu1 }
 0x1f7   : > { %v1359_v59 = vmul.f32 %v1351_v52, %v1335_v38  ;;  %v1350_v3 = vadd.f32 0.0009, %v1342_v53  ;;  %v1297_v62 = vmul.f32 2.0, %v1273_v54  ;;  %v1272_v6 = vsub.f32 %v1193_v19, %v2248_v40  ;;  %v1908_v0 = vpop.eup %1907 }
 0x1f8   : > { %v1275_v11 = vsub.f32 %v1874_v39, %v2258_v2  ;;  %v1203_v12 = vpop.f32.mrf.mxu1  ;;  %v1292_v34 = vadd.f32 0.0001, %v1284_v18 }
 0x1f9   : > { %v1358_v58 = vmul.f32 %v1350_v3, %v1334_v57  ;;  %v1305_v17 = vadd.f32 0.0009, %v1297_v62  ;;  %v1296_v20 = vmul.f32 2.0, %v1272_v6  ;;  %1919 = vrcp.f32 %v1359_v59  ;;  %v1910_v28 = vpop.eup %1909 }
 0x1fa   : > { %v1299_v22 = vmul.f32 2.0, %v1275_v11  ;;  %v1274_v13 = vsub.f32 %v1203_v12, %v1250_v31  ;;  %v1877_v23 = vpop.f32.mrf.mxu1  ;;  %v1295_v59 = vadd.f32 0.0001, %v1287_v32 }
 0x1fb   : > { %1921 = vrcp.f32 %v1358_v58  ;;  %v1313_v40 = vmul.f32 %v1305_v17, %v2252_v49  ;;  %v1304_v24 = vadd.f32 0.0009, %v1296_v20  ;;  %v1277_v25 = vsub.f32 %v1877_v23, %v1253_v48 }
 0x1fc   : > { %v1307_v2 = vadd.f32 0.0009, %v1299_v22  ;;  %v1298_v26 = vmul.f32 2.0, %v1274_v13  ;;  %v1213_v27 = vpop.f32.mrf.mxu1  ;;  %v1912_v1 = vpop.eup %1911  ;;  %v1286_v49 = vmul.f32 2.0, %v1254_v21 }
 0x1fd   : > { %v1369_v60 = vmul.f32 %v1908_v0, %v1313_v40  ;;  %v1312_v4 = vmul.f32 %v1304_v24, %v1288_v55  ;;  %v1301_v29 = vmul.f32 2.0, %v1277_v25  ;;  %v1276_v30 = vsub.f32 %v1213_v27, %v1252_v16 }
 0x1fe   : > { %v1306_v31 = vadd.f32 0.0009, %v1298_v26  ;;  %v1880_v14 = vpop.f32.mrf.mxu1  ;;  %v1914_v33 = vpop.eup %1913  ;;  %v1315_v41 = vmul.f32 %v1307_v2, %v1291_v63  ;;  %v1294_v56 = vadd.f32 0.0001, %v1286_v49 }
 0x1ff   : > { %v1368_v35 = vmul.f32 %v1910_v28, %v1312_v4  ;;  %v1300_v36 = vmul.f32 2.0, %v1276_v30  ;;  %v1309_v15 = vadd.f32 0.0009, %v1301_v29  ;;  %v1279_v37 = vsub.f32 %v1880_v14, %v1255_v10 }
 0x200   : > { %v1314_v42 = vmul.f32 %v1306_v31, %v1290_v8  ;;  %v1223_v43 = vpop.f32.mrf.mxu1  ;;  %v1377_v61 = vsel %vm296_vm0, %v1369_v60, 0.0  ;;  %v1371_v48 = vmul.f32 %v1912_v1, %v1315_v41 }
 0x201   : > { %v1376_v5 = vsel %vm296_vm0, %v1368_v35, 0.0  ;;  %v1308_v44 = vadd.f32 0.0009, %v1300_v36  ;;  %v1278_v45 = vsub.f32 %v1223_v43, %v1254_v21  ;;  %v1916_v46 = vpop.eup %1915  ;;  %v1303_v38 = vmul.f32 2.0, %v1279_v37 }
 0x202   : > { %v1378_v47 = vadd.f32 %v1377_v61, %v1376_v5  ;;  %v1370_v16 = vmul.f32 %v1914_v33, %v1314_v42  ;;  %v1317_v54 = vmul.f32 %v1309_v15, %v1293_v9  ;;  %v1381_v3 = vsel %vm296_vm0, %v1371_v48, 0.0 }
 0x203   : > { %v1918_v50 = vpop.eup %1917  ;;  %v1316_v51 = vmul.f32 %v1308_v44, %v1292_v34  ;;  %v1302_v52 = vmul.f32 2.0, %v1278_v45  ;;  %v1311_v55 = vadd.f32 0.0009, %v1303_v38 }
 0x204   : > { %v1379_v53 = vsel %vm296_vm0, %v1370_v16, 0.0  ;;  %v1373_v62 = vmul.f32 %v1916_v46, %v1317_v54 }
 0x205   : > { %v1380_v57 = vadd.f32 %v1379_v53, %v1378_v47  ;;  %v1372_v19 = vmul.f32 %v1918_v50, %v1316_v51  ;;  %v1310_v39 = vadd.f32 0.0009, %v1302_v52  ;;  %v1319_v12 = vmul.f32 %v1311_v55, %v1295_v59 }
 0x206   : > { %v1920_v6 = vpop.eup %1919  ;;  %v1385_v20 = vsel %vm296_vm0, %v1373_v62, 0.0 }
 0x207   : > { %v1318_v63 = vmul.f32 %v1310_v39, %v1294_v56  ;;  %v1382_v7 = vadd.f32 %v1381_v3, %v1380_v57  ;;  %v1383_v10 = vsel %vm296_vm0, %v1372_v19, 0.0  ;;  %v1375_v17 = vmul.f32 %v1920_v6, %v1319_v12 }
 0x208   : > { %v1922_v11 = vpop.eup %1921 }
 0x209   : > { %v1374_v18 = vmul.f32 %v1922_v11, %v1318_v63  ;;  %v1384_v58 = vadd.f32 %v1383_v10, %v1382_v7  ;;  %v1389_v23 = vsel %vm296_vm0, %v1375_v17, 0.0 }
 0x20b   : > { %v1386_v21 = vadd.f32 %v1385_v20, %v1384_v58  ;;  %v1387_v22 = vsel %vm296_vm0, %v1374_v18, 0.0 }
 0x20d   : > { %v1388_v13 = vadd.f32 %v1387_v22, %v1386_v21 }
 0x20f   : > { %v1390_v40 = vadd.f32 %v1389_v23, %v1388_v13 }
 0x211   : > { %1391 = vadd.xlane.f32.xlu0 %v1390_v40 }
 0x29a   : > { %v1392_v24 = vpop.xlane.xlu0 %1391 }
 0x29b   : > { %v1393_v25 = vrot.slane %v1392_v24, 4 }
 0x29d   : > { %v1394_v0 = vadd.f32 %v1393_v25, %v1392_v24 }
 0x29f   : > { %v1395_v8 = vrot.slane %v1394_v0, 2 }
 0x2a1   : > { %v1396_v2 = vadd.f32 %v1395_v8, %v1394_v0 }
 0x2a3   : > { %v1397_v26 = vrot.slane %v1396_v2, 1 }
 0x2a5   : > { %v1398_v27 = vadd.f32 %v1397_v26, %v1396_v2 }
 0x2a7   : > { %1897 = vpush %v1398_v27 }
 0x2d8   : > { %s1898_s23 = spop %1897 }
 0x2d9   : > { %v1400_v28 = vstv %s1898_s23 }
 0x2da   : > { %1402 = vst.msk [vmem:[%s213_s22] sm:$0x1] %vm1401_vm2, %v1400_v28 }
 0x2db PF: > { %s14_s15 = sadd.s32 1, %s1929_s15  }
 0x2dc   : > { %p11_p4 = scmp.ge.s32.totalorder %s14_s15, 4  }
 0x2de   :  { %13 = sbr.rel (!%p11_p4) target bundleno = 1 (0x1), region = 69 }

</bundles_post_ra>
